<compile_context>
chip_gen: v7x
topology: tpu7x:2x2x1
jax: 0.10.0
libtpu: 0.0.40
codegen_flags: <defaults>
</compile_context>

<pallas_src>
import functools

import jax
import jax.numpy as jnp
from jax.experimental import pallas as pl
from jax.experimental.pallas import tpu as pltpu


def _twin_critic_kernel(x_ref, a_ref, w1_ref, b1_ref, w2_ref, b2_ref,
                        w3_ref, b3_ref, o_ref):
    # Fused concat(x, actions) along the lane axis (XLU slot, otherwise idle).
    xa = jnp.concatenate([x_ref[...], a_ref[...]], axis=-1)          # (bt, S+A)
    # Layer 1: one MXU pass over the lane-fused (S+A, 2*H1) weight.
    h = jnp.dot(xa.astype(w1_ref.dtype), w1_ref[...],
                preferred_element_type=jnp.float32)
    h = jnp.maximum(h + b1_ref[...], 0.0)                            # f32 bias+ReLU (VPU)
    # Layer 2: one MXU pass over the block-diagonal (2*H1, 2*H2) weight.
    h = jnp.dot(h.astype(w2_ref.dtype), w2_ref[...],
                preferred_element_type=jnp.float32)
    h = jnp.maximum(h + b2_ref[...], 0.0)                            # (bt, 2*H2)
    # Layer 3 (O=1 per critic): VPU multiply + XLU lane reduce, no MXU pass.
    p = h * w3_ref[...]                                              # (bt, 2*H2)
    h2 = p.shape[-1] // 2
    q1 = jnp.sum(p[:, :h2], axis=-1, keepdims=True)                  # (bt, 1)
    q2 = jnp.sum(p[:, h2:], axis=-1, keepdims=True)                  # (bt, 1)
    o = jnp.concatenate([q1, q2], axis=-1) + b3_ref[...]             # (bt, 2)
    o_ref[...] = o.astype(o_ref.dtype)


def _pick_batch_tile(B, batch_tile):
    # Cap so 2x double-buffered (bt*S + bt*A + bt*2) f32 tiles stay far below
    # v7x's 32 MiB scoped / 64 MiB physical VMEM.
    cap = 2048
    bt = min(B, 1024) if batch_tile is None else min(batch_tile, B)
    bt = min(bt, cap)
    if bt >= B:
        return B                       # full-dim block is always legal
    # Second-to-last block dim must be a multiple of 8 (f32 sublane) when != B.
    bt = max(8, (bt // 8) * 8)
    return bt


def _twin_critic_pallas(x, actions, params, batch_tile):
    w1, b1, w2, b2, w3, b3 = params
    B, S = x.shape
    A = actions.shape[1]
    H1f = w1.shape[1]                  # 2 * H1 (both critics fused on lanes)
    H2f = w2.shape[1]                  # 2 * H2
    Of = b3.shape[1]                   # 2 (q1, q2)

    bt = _pick_batch_tile(B, batch_tile)
    grid = (pl.cdiv(B, bt),)

    act_map = lambda b: (b, 0)
    const_map = lambda b: (0, 0)       # weights stay VMEM-resident across tiles

    itemsize = lambda t: t.size * t.dtype.itemsize
    flops = 2 * B * (S + A) * H1f + 2 * B * H1f * H2f + 2 * B * H2f
    bytes_accessed = (itemsize(x) + itemsize(actions)
                      + sum(itemsize(p) for p in params) + B * Of * 4)

    return pl.pallas_call(
        _twin_critic_kernel,
        out_shape=jax.ShapeDtypeStruct((B, Of), jnp.float32),
        grid_spec=pltpu.PrefetchScalarGridSpec(
            num_scalar_prefetch=0,
            grid=grid,
            in_specs=[
                pl.BlockSpec((bt, S), act_map),
                pl.BlockSpec((bt, A), act_map),
                pl.BlockSpec((S + A, H1f), const_map),
                pl.BlockSpec((1, H1f), const_map),
                pl.BlockSpec((H1f, H2f), const_map),
                pl.BlockSpec((1, H2f), const_map),
                pl.BlockSpec((1, H2f), const_map),
                pl.BlockSpec((1, Of), const_map),
            ],
            out_specs=pl.BlockSpec((bt, Of), act_map),
        ),
        compiler_params=pltpu.CompilerParams(
            dimension_semantics=("parallel",)),
        cost_estimate=pl.CostEstimate(
            flops=flops, transcendentals=0, bytes_accessed=bytes_accessed),
    )(x, actions, w1, b1, w2, b2, w3, b3)


@functools.partial(jax.jit, static_argnames=("batch_tile",))
def critic_forward(x, actions, params, batch_tile=None):
    """params = fused twin-critic params from fuse_critic_params().

    Returns (q1, q2), each (B, 1), matching Critic.forward.
    """
    out = _twin_critic_pallas(x, actions, params, batch_tile)        # (B, 2)
    return out[:, 0:1], out[:, 1:2]


# ---------------------------------------------------------------------------
# Parameter construction (PyTorch nn.Linear-compatible init, (in, out) layout)
# ---------------------------------------------------------------------------

def init_linear(key, fan_in, fan_out):
    # PyTorch nn.Linear default init: U(-1/sqrt(fan_in), 1/sqrt(fan_in)).
    kw, kb = jax.random.split(key)
    bound = 1.0 / jnp.sqrt(jnp.float32(fan_in))
    w = jax.random.uniform(kw, (fan_in, fan_out), jnp.float32, -bound, bound)
    b = jax.random.uniform(kb, (1, fan_out), jnp.float32, -bound, bound)
    return w, b


def init_mlp(key, dims):
    assert len(dims) == 4, "this kernel implements the 3-layer (len(dims)==4) case"
    # TODO(synk): generalize to arbitrary len(dims) by looping layers in-kernel.
    keys = jax.random.split(key, 3)
    params = []
    for i in range(3):
        params.extend(init_linear(keys[i], dims[i], dims[i + 1]))
    return tuple(params)


def fuse_critic_params(q1_params, q2_params, param_dtype=jnp.float32):
    """Fuse both critics along the feature/lane axis (one-time, amortized).

    W1 -> (S+A, 2*H1), W2 -> block-diag (2*H1, 2*H2), W3 -> (1, 2*H2) row,
    biases concatenated.  Matmul weights optionally cast to `param_dtype`
    (bf16 path); biases and the layer-3 row stay f32.
    """
    w1a, b1a, w2a, b2a, w3a, b3a = q1_params
    w1b, b1b, w2b, b2b, w3b, b3b = q2_params
    H1, H2 = w2a.shape

    w1 = jnp.concatenate([w1a, w1b], axis=1).astype(param_dtype)      # (S+A, 2*H1)
    b1 = jnp.concatenate([b1a, b1b], axis=1)                          # (1, 2*H1)
    top = jnp.concatenate([w2a, jnp.zeros((H1, H2), w2a.dtype)], axis=1)
    bot = jnp.concatenate([jnp.zeros((H1, H2), w2b.dtype), w2b], axis=1)
    w2 = jnp.concatenate([top, bot], axis=0).astype(param_dtype)      # (2*H1, 2*H2)
    b2 = jnp.concatenate([b2a, b2b], axis=1)                          # (1, 2*H2)
    w3 = jnp.concatenate([w3a[:, 0], w3b[:, 0]], axis=0)[None, :]     # (1, 2*H2)
    b3 = jnp.concatenate([b3a, b3b], axis=1)                          # (1, 2)
    return (w1, b1, w2, b2, w3, b3)


def _mlp3_ref(xa, w1, b1, w2, b2, w3, b3):
    h = jnp.maximum(xa @ w1 + b1, 0.0)
    h = jnp.maximum(h @ w2 + b2, 0.0)
    return h @ w3 + b3


if __name__ == "__main__":
    # Small shapes consistent with a TD3 critic: state_dim=24, action_dim=8,
    # so dims = [32, 32, 32, 1]; batch = 2.
    batch, state_dim, action_dim = 2, 24, 8
    hidden = 32
    dims = [state_dim + action_dim, hidden, hidden, 1]

    key = jax.random.PRNGKey(0)
    kx, ka, kq1, kq2 = jax.random.split(key, 4)

    x = jax.random.normal(kx, (batch, state_dim), jnp.float32)
    actions = jax.random.normal(ka, (batch, action_dim), jnp.float32)

    q1_params = init_mlp(kq1, dims)
    q2_params = init_mlp(kq2, dims)
    params = fuse_critic_params(q1_params, q2_params)

    q1, q2 = critic_forward(x, actions, params)
    jax.block_until_ready((q1, q2))

    # Correctness check against a pure-JAX reference (unfused params).
    xa = jnp.concatenate([x, actions], axis=1)
    q1_ref = _mlp3_ref(xa, *q1_params)
    q2_ref = _mlp3_ref(xa, *q2_params)
    assert q1.shape == (batch, 1) and q2.shape == (batch, 1)
    assert jnp.allclose(q1, q1_ref, atol=1e-5, rtol=1e-5)
    assert jnp.allclose(q2, q2_ref, atol=1e-5, rtol=1e-5)

    # Multi-tile / ragged-batch path: B not divisible by the (rounded) tile.
    B2 = 20
    kx2, ka2 = jax.random.split(jax.random.PRNGKey(1))
    x2 = jax.random.normal(kx2, (B2, state_dim), jnp.float32)
    a2 = jax.random.normal(ka2, (B2, action_dim), jnp.float32)
    q1b, q2b = critic_forward(x2, a2, params, batch_tile=12)   # rounds to 8 -> 3 tiles
    jax.block_until_ready((q1b, q2b))
    xa2 = jnp.concatenate([x2, a2], axis=1)
    assert jnp.allclose(q1b, _mlp3_ref(xa2, *q1_params), atol=1e-5, rtol=1e-5)
    assert jnp.allclose(q2b, _mlp3_ref(xa2, *q2_params), atol=1e-5, rtol=1e-5)

    # bf16 path: weights cast once at fuse time, activations cast in-kernel,
    # f32 accumulation / bias / ReLU.  Looser tolerance vs the f32 reference.
    params_bf16 = fuse_critic_params(q1_params, q2_params, param_dtype=jnp.bfloat16)
    q1c, q2c = critic_forward(x, actions, params_bf16)
    jax.block_until_ready((q1c, q2c))
    assert jnp.allclose(q1c, q1_ref, atol=1e-1, rtol=1e-1)
    assert jnp.allclose(q2c, q2_ref, atol=1e-1, rtol=1e-1)

    print("KERNEL_OK")
</pallas_src>

<mosaic_0001>
module attributes {stable_mosaic.version = 11 : i64} {
  func.func @_twin_critic_kernel(%arg0: i32, %arg1: memref<2x24xf32, #tpu.memory_space<vmem>>, %arg2: memref<2x8xf32, #tpu.memory_space<vmem>>, %arg3: memref<32x64xf32, #tpu.memory_space<vmem>>, %arg4: memref<1x64xf32, #tpu.memory_space<vmem>>, %arg5: memref<64x64xf32, #tpu.memory_space<vmem>>, %arg6: memref<1x64xf32, #tpu.memory_space<vmem>>, %arg7: memref<1x64xf32, #tpu.memory_space<vmem>>, %arg8: memref<1x2xf32, #tpu.memory_space<vmem>>, %arg9: memref<2x2xf32, #tpu.memory_space<vmem>>) attributes {dimension_semantics = [#tpu.dimension_semantics<parallel>], iteration_bounds = array<i64: 1>, scalar_prefetch = 0 : i64, scratch_operands = 0 : i64, tpu.core_type = #tpu.core_type<tc>, window_params = [{transform_indices = @transform_0, window_bounds = array<i64: 2, 24>}, {transform_indices = @transform_1, window_bounds = array<i64: 2, 8>}, {pipeline_mode = #tpu.pipeline_mode<synchronous>, transform_indices = @transform_2, window_bounds = array<i64: 32, 64>}, {pipeline_mode = #tpu.pipeline_mode<synchronous>, transform_indices = @transform_3, window_bounds = array<i64: 1, 64>}, {pipeline_mode = #tpu.pipeline_mode<synchronous>, transform_indices = @transform_4, window_bounds = array<i64: 64, 64>}, {pipeline_mode = #tpu.pipeline_mode<synchronous>, transform_indices = @transform_5, window_bounds = array<i64: 1, 64>}, {pipeline_mode = #tpu.pipeline_mode<synchronous>, transform_indices = @transform_6, window_bounds = array<i64: 1, 64>}, {pipeline_mode = #tpu.pipeline_mode<synchronous>, transform_indices = @transform_7, window_bounds = array<i64: 1, 2>}, {transform_indices = @transform_8, window_bounds = array<i64: 2, 2>}]} {
    %c0 = arith.constant 0 : index
    %c0_0 = arith.constant 0 : index
    %0 = vector.load %arg1[%c0, %c0_0] : memref<2x24xf32, #tpu.memory_space<vmem>>, vector<2x24xf32>
    %c0_1 = arith.constant 0 : index
    %c0_2 = arith.constant 0 : index
    %1 = vector.load %arg2[%c0_1, %c0_2] : memref<2x8xf32, #tpu.memory_space<vmem>>, vector<2x8xf32>
    %2 = tpu.concatenate %0, %1 in 1 : vector<2x24xf32>, vector<2x8xf32> -> vector<2x32xf32>
    %c0_3 = arith.constant 0 : index
    %c0_4 = arith.constant 0 : index
    %3 = vector.load %arg3[%c0_3, %c0_4] : memref<32x64xf32, #tpu.memory_space<vmem>>, vector<32x64xf32>
    %cst = arith.constant dense<0.000000e+00> : vector<2x64xf32>
    %4 = tpu.matmul %2, %3, %cst {dimension_numbers = #tpu.dot_dimension_numbers<[1], [0], [0], [1], [0, 0, 1, 1], [], []>} : vector<2x32xf32>, vector<32x64xf32>, vector<2x64xf32> -> vector<2x64xf32>
    %c0_5 = arith.constant 0 : index
    %c0_6 = arith.constant 0 : index
    %5 = vector.load %arg4[%c0_5, %c0_6] : memref<1x64xf32, #tpu.memory_space<vmem>>, vector<1x64xf32>
    %6 = vector.broadcast %5 : vector<1x64xf32> to vector<2x64xf32>
    %7 = arith.addf %4, %6 : vector<2x64xf32>
    %cst_7 = arith.constant 0.000000e+00 : f32
    %8 = vector.broadcast %cst_7 : f32 to vector<2x64xf32>
    %9 = arith.maximumf %7, %8 : vector<2x64xf32>
    %c0_8 = arith.constant 0 : index
    %c0_9 = arith.constant 0 : index
    %10 = vector.load %arg5[%c0_8, %c0_9] : memref<64x64xf32, #tpu.memory_space<vmem>>, vector<64x64xf32>
    %cst_10 = arith.constant dense<0.000000e+00> : vector<2x64xf32>
    %11 = tpu.matmul %9, %10, %cst_10 {dimension_numbers = #tpu.dot_dimension_numbers<[1], [0], [0], [1], [0, 0, 1, 1], [], []>} : vector<2x64xf32>, vector<64x64xf32>, vector<2x64xf32> -> vector<2x64xf32>
    %c0_11 = arith.constant 0 : index
    %c0_12 = arith.constant 0 : index
    %12 = vector.load %arg6[%c0_11, %c0_12] : memref<1x64xf32, #tpu.memory_space<vmem>>, vector<1x64xf32>
    %13 = vector.broadcast %12 : vector<1x64xf32> to vector<2x64xf32>
    %14 = arith.addf %11, %13 : vector<2x64xf32>
    %cst_13 = arith.constant 0.000000e+00 : f32
    %15 = vector.broadcast %cst_13 : f32 to vector<2x64xf32>
    %16 = arith.maximumf %14, %15 : vector<2x64xf32>
    %c0_14 = arith.constant 0 : index
    %c0_15 = arith.constant 0 : index
    %17 = vector.load %arg7[%c0_14, %c0_15] : memref<1x64xf32, #tpu.memory_space<vmem>>, vector<1x64xf32>
    %18 = vector.broadcast %17 : vector<1x64xf32> to vector<2x64xf32>
    %19 = arith.mulf %16, %18 : vector<2x64xf32>
    %20 = vector.extract_strided_slice %19 {offsets = [0, 0], sizes = [2, 32], strides = [1, 1]} : vector<2x64xf32> to vector<2x32xf32>
    %cst_16 = arith.constant dense<0.000000e+00> : vector<2xf32>
    %21 = vector.multi_reduction <add>, %20, %cst_16 [1] : vector<2x32xf32> to vector<2xf32>
    %22 = vector.shape_cast %21 : vector<2xf32> to vector<2x1xf32>
    %23 = vector.extract_strided_slice %19 {offsets = [0, 32], sizes = [2, 32], strides = [1, 1]} : vector<2x64xf32> to vector<2x32xf32>
    %cst_17 = arith.constant dense<0.000000e+00> : vector<2xf32>
    %24 = vector.multi_reduction <add>, %23, %cst_17 [1] : vector<2x32xf32> to vector<2xf32>
    %25 = vector.shape_cast %24 : vector<2xf32> to vector<2x1xf32>
    %26 = tpu.concatenate %22, %25 in 1 : vector<2x1xf32>, vector<2x1xf32> -> vector<2x2xf32>
    %c0_18 = arith.constant 0 : index
    %c0_19 = arith.constant 0 : index
    %27 = vector.load %arg8[%c0_18, %c0_19] : memref<1x2xf32, #tpu.memory_space<vmem>>, vector<1x2xf32>
    %28 = vector.broadcast %27 : vector<1x2xf32> to vector<2x2xf32>
    %29 = arith.addf %26, %28 : vector<2x2xf32>
    %c0_20 = arith.constant 0 : index
    %c0_21 = arith.constant 0 : index
    %30 = vector.load %arg9[%c0_20, %c0_21] : memref<2x2xf32, #tpu.memory_space<vmem>>, vector<2x2xf32>
    tpu.vector_store %arg9[%c0_20, %c0_21], %29 {strides = array<i32>} : memref<2x2xf32, #tpu.memory_space<vmem>>, vector<2x2xf32>,
    return
  }
  func.func @transform_0(%arg0: i32) -> (i32, i32) {
    %c0_i32 = arith.constant 0 : i32
    %c0_i32_0 = arith.constant 0 : i32
    return %arg0, %c0_i32 : i32, i32
  }
  func.func @transform_1(%arg0: i32) -> (i32, i32) {
    %c0_i32 = arith.constant 0 : i32
    %c0_i32_0 = arith.constant 0 : i32
    return %arg0, %c0_i32 : i32, i32
  }
  func.func @transform_2(%arg0: i32) -> (i32, i32) {
    %c0_i32 = arith.constant 0 : i32
    %c0_i32_0 = arith.constant 0 : i32
    %c0_i32_1 = arith.constant 0 : i32
    return %c0_i32, %c0_i32_0 : i32, i32
  }
  func.func @transform_3(%arg0: i32) -> (i32, i32) {
    %c0_i32 = arith.constant 0 : i32
    %c0_i32_0 = arith.constant 0 : i32
    %c0_i32_1 = arith.constant 0 : i32
    return %c0_i32, %c0_i32_0 : i32, i32
  }
  func.func @transform_4(%arg0: i32) -> (i32, i32) {
    %c0_i32 = arith.constant 0 : i32
    %c0_i32_0 = arith.constant 0 : i32
    %c0_i32_1 = arith.constant 0 : i32
    return %c0_i32, %c0_i32_0 : i32, i32
  }
  func.func @transform_5(%arg0: i32) -> (i32, i32) {
    %c0_i32 = arith.constant 0 : i32
    %c0_i32_0 = arith.constant 0 : i32
    %c0_i32_1 = arith.constant 0 : i32
    return %c0_i32, %c0_i32_0 : i32, i32
  }
  func.func @transform_6(%arg0: i32) -> (i32, i32) {
    %c0_i32 = arith.constant 0 : i32
    %c0_i32_0 = arith.constant 0 : i32
    %c0_i32_1 = arith.constant 0 : i32
    return %c0_i32, %c0_i32_0 : i32, i32
  }
  func.func @transform_7(%arg0: i32) -> (i32, i32) {
    %c0_i32 = arith.constant 0 : i32
    %c0_i32_0 = arith.constant 0 : i32
    %c0_i32_1 = arith.constant 0 : i32
    return %c0_i32, %c0_i32_0 : i32, i32
  }
  func.func @transform_8(%arg0: i32) -> (i32, i32) {
    %c0_i32 = arith.constant 0 : i32
    %c0_i32_0 = arith.constant 0 : i32
    return %arg0, %c0_i32 : i32, i32
  }
}

</mosaic_0001>

<bundles_post_ra>
// kernel: critic_forward.1
= control target key start
LH: loop header
LB: loop body
LE: loop exit
PB: predicated region body
PF: predicated region fallthrough
CT: control target
= control target key end

     0   :  { %13 = vsyncpa [#allocation3], 0  ;;  %s552_s0 = inlined_call_operand.hbm [shape: f32[2,24], index: 0, kind: input, shape index: {}]   ;;  %s553_s1 = inlined_call_operand.vmem [shape: f32[2,8], index: 1, kind: input, shape index: {}]   ;;  %s554_s2 = inlined_call_operand.hbm [shape: f32[32,64], index: 2, kind: input, shape index: {}]   ;;  %s555_s3 = inlined_call_operand.vmem [shape: f32[1,64], index: 3, kind: input, shape index: {}]   ;;  %s556_s4 = inlined_call_operand.hbm [shape: f32[64,64], index: 4, kind: input, shape index: {}]   ;;  %s557_s5 = inlined_call_operand.vmem [shape: f32[1,64], index: 5, kind: input, shape index: {}]   ;;  %s558_s6 = inlined_call_operand.vmem [shape: f32[1,64], index: 6, kind: input, shape index: {}]   ;;  %s559_s7 = inlined_call_operand.vmem [shape: f32[1,2], index: 7, kind: input, shape index: {}]   ;;  %s560_s8 = inlined_call_operand.vmem [shape: f32[2,2], index: 8, kind: output, shape index: {}]  }
   0x1   :  { %14 = vsyncpa [#allocation5], 0  ;;  %s437_s27 = smov [#allocation4]   ;;  %s367_s9 = scalar_lea.hbm %s554_s2, 512 }
   0x2   :  { %s32_s28 = sshll.u32 %s437_s27, 4  ;;  %p368_p0 = scmp.ne.s32.totalorder %s554_s2, %s367_s9  ;;  %s33_s28 = int_to_ptr.vmem [resolvable:$true] %s32_s28 }
   0x3   :  { %p371_p1 = scmp.lt.u32.totalorder %s367_s9, %s554_s2 }
   0x5   :  { %p373_p2 = pnand %p371_p1, %p368_p0 }
   0x7   :  { %376 = shalt.err (!%p373_p2)
}
   0x8   :  { %s377_s14 = scalar_lea.vmem %s33_s28, 512  ;;  %p382_p4 = scmp.lt.s32.totalorder %s33_s28, %s33_s28 }
   0x9   :  { %p378_p3 = scmp.ne.s32.totalorder %s33_s28, %s377_s14  ;;  %p383_p5 = scmp.lt.s32.totalorder %s377_s14, %s377_s14 }
   0xb   :  { %p384_p6 = por %p383_p5, %p382_p4 }
   0xd   :  { %p385_p7 = pnand %p384_p6, %p378_p3 }
   0xf   :  { %388 = shalt.err (!%p385_p7)
}
  0x10   :  { %s438_s15 = smov 128   ;;  %s439_s16 = smov 8  }
  0x11   :  { %38 = dma.hbm_to_vmem [thread:$0]  %s554_s2, 512, %s33_s28, [#allocation5], %s438_s15, %s438_s15, %s439_s16  }
  0x12   :  { %s440_s19 = smov [#allocation2]   ;;  %s441_s21 = smov [#allocation6]  }
  0x13   :  { %s21_s20 = sshll.u32 %s440_s19, 4  ;;  %s46_s22 = sshll.u32 %s441_s21, 4  ;;  %s22_s20 = int_to_ptr.vmem [resolvable:$true] %s21_s20  ;;  %s47_s22 = int_to_ptr.vmem [resolvable:$true] %s46_s22 }
  0x14   :  { %s389_s25 = scalar_lea.hbm %s552_s0, 32 }
  0x15   :  { %p390_p8 = scmp.ne.s32.totalorder %s552_s0, %s389_s25  ;;  %p393_p9 = scmp.lt.u32.totalorder %s389_s25, %s552_s0 }
  0x17   :  { %p395_p10 = pnand %p393_p9, %p390_p8 }
  0x19   :  { %398 = shalt.err (!%p395_p10)
}
  0x1a   :  { %s399_s2 = scalar_lea.vmem %s22_s20, 32  ;;  %p404_p12 = scmp.lt.s32.totalorder %s22_s20, %s22_s20 }
  0x1b   :  { %p400_p11 = scmp.ne.s32.totalorder %s22_s20, %s399_s2  ;;  %p405_p13 = scmp.lt.s32.totalorder %s399_s2, %s399_s2 }
  0x1d   :  { %p406_p0 = por %p405_p13, %p404_p12 }
  0x1f   :  { %p407_p1 = pnand %p406_p0, %p400_p11 }
  0x21   :  { %410 = shalt.err (!%p407_p1)
}
  0x22   :  { %24 = dma.hbm_to_vmem [thread:$0]  %s552_s0, 32, %s22_s20, [#allocation3]  }
  0x23   :  { %s411_s12 = scalar_lea.hbm %s556_s4, 1024 }
  0x24   :  { %p412_p2 = scmp.ne.s32.totalorder %s556_s4, %s411_s12  ;;  %p415_p3 = scmp.lt.u32.totalorder %s411_s12, %s556_s4 }
  0x26   :  { %p417_p4 = pnand %p415_p3, %p412_p2 }
  0x28   :  { %420 = shalt.err (!%p417_p4)
}
  0x29   :  { %s421_s19 = scalar_lea.vmem %s47_s22, 1024  ;;  %p426_p6 = scmp.lt.s32.totalorder %s47_s22, %s47_s22 }
  0x2a   :  { %p422_p5 = scmp.ne.s32.totalorder %s47_s22, %s421_s19  ;;  %p427_p7 = scmp.lt.s32.totalorder %s421_s19, %s421_s19 }
  0x2c   :  { %p428_p8 = por %p427_p7, %p426_p6 }
  0x2e   :  { %p429_p9 = pnand %p428_p8, %p422_p5 }
  0x30   :  { %432 = shalt.err (!%p429_p9)
}
  0x31   :  { %52 = dma.hbm_to_vmem [thread:$0]  %s556_s4, 1024, %s47_s22, [#allocation5], %s438_s15, %s438_s15, %s439_s16  }
  0x32   :  { %433 = dma.done.wait [#allocation3], 32  }
  0x33   :  { %434 = vsyncadd [#allocation3], 4294967264 }
  0x34   :  { %435 = dma.done.wait [#allocation5], 1536  }
  0x35   :  { %436 = vsyncadd [#allocation5], 4294965760  ;;  %v442_v0 = vmov 0.0|0.0   ;;  %vm443_vm0 = vmmov 0   ;;  %v444_v1 = vmov 0.0   ;;  %v76_v3 = vld [vmem:[#allocation4] sm:$0xff] }
  0x36   :  { %339 = vmatprep.subr.bf16.mxu0 %v442_v0  ;;  %345 = vmatprep.subr.bf16.mxu1 %v442_v0  ;;  %v69_v2 = vld [vmem:[%s553_s1] sm:$0x3]  ;;  %v77_v4 = vld [vmem:[#allocation4 + $0x8] sm:$0xff]  ;;  %s445_s24 = smov 24   ;;  %v78_v6 = vld [vmem:[#allocation4 + $0x10] sm:$0xff]  ;;  %vm74_vm1 = vcmask 195584  }
  0x37   :  { %317 = vmatprep.mubr.msk.f32.mxu0 %vm443_vm0, %v444_v1  ;;  %336 = vmatprep.mubr.msk.f32.mxu1 %vm443_vm0, %v444_v1  ;;  %v340_v5 = vpack.c.bf16 %v77_v4, %v76_v3  ;;  %v79_v7 = vld [vmem:[#allocation4 + $0x18] sm:$0xff]  ;;  %v162_v8 = vld [vmem:[#allocation6] sm:$0xff]  ;;  %v163_v9 = vld [vmem:[#allocation6 + $0x8] sm:$0xff]  ;;  %vm87_vm2 = vcmask 261120   ;;  %vm177_vm3 = vcmask 523264   ;;  %vm260_vm4 = vcmask 254976  }
  0x38   :  { %71 = vrot.lane.b32.xlu0 %v69_v2, %s445_s24  ;;  %v164_v10 = vld [vmem:[#allocation6 + $0x10] sm:$0xff]  ;;  %v343_v11 = vpack.c.bf16 %v79_v7, %v78_v6  ;;  %v346_v12 = vpack.c.bf16 %v163_v9, %v162_v8  ;;  %v165_v13 = vld [vmem:[#allocation6 + $0x18] sm:$0xff]  ;;  %v166_v15 = vld [vmem:[#allocation6 + $0x20] sm:$0xff]  ;;  %vm271_vm5 = vcmask 7168   ;;  %vm281_vm6 = vcmask 9216  }
  0x39   :  { %341 = vmatpush3.bf16.msra.mxu0 %v340_v5  ;;  %v349_v14 = vpack.c.bf16 %v165_v13, %v164_v10  ;;  %v167_v16 = vld [vmem:[#allocation6 + $0x28] sm:$0xff]  ;;  %v68_v18 = vld [vmem:[#allocation2] sm:$0x3]  ;;  %v168_v21 = vld [vmem:[#allocation6 + $0x30] sm:$0xff] }
  0x3a   :  { %342 = vmatprep.subr.bf16.mxu0 %v442_v0  ;;  %347 = vmatpush3.bf16.msra.mxu1 %v346_v12  ;;  %v352_v17 = vpack.c.bf16 %v167_v16, %v166_v15  ;;  %v169_v22 = vld [vmem:[#allocation6 + $0x38] sm:$0xff] }
  0x3b   :  { %348 = vmatprep.subr.bf16.mxu1 %v442_v0  ;;  %v355_v23 = vpack.c.bf16 %v169_v22, %v168_v21  ;;  %v289_v24 = vld [vmem:[%s555_s3] ss:$0 sm:$0xff]  ;;  %s446_s3 = smov 96  }
  0x3c   :  { %v291_v29 = vld [vmem:[%s557_s5] ss:$0 sm:$0xff] }
  0x3d   :  { %344 = vmatpush3.bf16.msra.mxu0 %v343_v11  ;;  %v293_v33 = vld [vmem:[%s558_s6] ss:$0 sm:$0xff] }
  0x3e   :  { %350 = vmatpush3.bf16.msra.mxu1 %v349_v14  ;;  %v294_v40 = vld [vmem:[%s559_s7] ss:$0 sm:$0xff] }
  0x3f   :  { %351 = vmatprep.subr.bf16.mxu1 %v442_v0 }
  0x42   :  { %353 = vmatpush3.bf16.msra.mxu1 %v352_v17 }
  0x43   :  { %354 = vmatprep.subr.bf16.mxu1 %v442_v0 }
  0x46   :  { %356 = vmatpush3.bf16.msra.mxu1 %v355_v23 }
  0xaa   :  { %v72_v19 = vpop.permute.xlu0 %71 }
  0xab   :  { %v75_v20 = vsel %vm74_vm1, %v68_v18, %v72_v19 }
  0xac   :  { %318 = vmatmul.mubr.msk.f32.vlgmr.msra.gmra.mrb[0].mxu0 %vm87_vm2, %v75_v20 }
 0x17f   :  { %v157_v25 = vpop.f32.mrb[0].mxu0 }
 0x180   :  { %v158_v26 = vadd.f32 %v289_v24, %v157_v25  ;;  %v319_v27 = vpop.f32.mrb[1].mxu0 }
 0x182   :  { %v161_v28 = vmax.f32 %v158_v26, 0.0 }
 0x184   :  { %337 = vmatmul.mubr.msk.f32.vlgmr.msra.gmra.mrb[0].mxu1 %vm177_vm3, %v161_v28 }
 0x257   :  { %v247_v30 = vpop.f32.mrb[0].mxu1 }
 0x258   :  { %v248_v31 = vadd.f32 %v291_v29, %v247_v30  ;;  %v338_v32 = vpop.f32.mrb[1].mxu1 }
 0x25a   :  { %v251_v34 = vmax.f32 %v248_v31, 0.0 }
 0x25c   :  { %v259_v35 = vmul.f32 %v293_v33, %v251_v34 }
 0x25e   :  { %265 = vrot.lane.b32.xlu0 %v259_v35, %s446_s3  ;;  %v261_v36 = vsel %vm260_vm4, %v259_v35, 0.0 }
 0x25f   :  { %262 = vadd.xlane.f32.xlu1 %v261_v36 }
 0x2d0   :  { %v266_v37 = vpop.permute.xlu0 %265 }
 0x2d1   :  { %v268_v38 = vsel %vm260_vm4, %v266_v37, 0.0 }
 0x2d2   :  { %269 = vadd.xlane.f32.xlu1 %v268_v38 }
 0x2ec   :  { %v263_v39 = vpop.xlane.xlu1 %262 }
 0x35f   :  { %v270_v41 = vpop.xlane.xlu1 %269 }
 0x360   :  { %v272_v42 = vsel %vm271_vm5, %v263_v39, %v270_v41 }
 0x361   :  { %v280_v43 = vadd.f32 %v294_v40, %v272_v42 }
 0x363   :  { %282 = vst.msk [vmem:[%s560_s8] sm:$0x3] %vm281_vm6, %v280_v43 }
 0x364   :  { %287 = vsyncpa [#allocation3], 1 }
 0x365   :  { %288 = vsyncpa [#allocation5], 1 }

</bundles_post_ra>
